<compile_context>
chip_gen: v7x
topology: tpu7x:2x2x1
jax: 0.10.0
libtpu: 0.0.40
codegen_flags: <defaults>
</compile_context>

<pallas_src>
import functools

import jax
import jax.numpy as jnp
from jax import lax
from jax.experimental import pallas as pl
from jax.experimental.pallas import tpu as pltpu

LANES = 128


def _conv_bn_relu_kernel(x_ref, w_ref, b_ref, o_ref, *, use_fat_k):
    # x_ref : (1, H+2, W+2, Cin)   bf16 padded image (whole, per batch elem)
    # w_ref : (9, Cin, Cout_p)     bf16 BN-scale-folded weights (kh*3+kw major)
    # b_ref : (1, Cout_p)          f32 folded BN bias
    # o_ref : (1, TH, W, Cout_p)   output tile (bf16 or f32)
    TH = o_ref.shape[1]
    W = o_ref.shape[2]
    Cp = o_ref.shape[3]
    Cin = w_ref.shape[1]

    r = pl.program_id(1)
    row0 = pl.multiple_of(r * TH, TH)

    # One dynamic row-window load (third-minor axis -> alignment-free), then
    # slice the three kw column views once each; kh shifts are free
    # leading-dim slices of those views.
    xwin = x_ref[0, pl.ds(row0, TH + 2), :, :]            # (TH+2, W+2, Cin)
    cols = [xwin[:, kw:kw + W, :] for kw in range(3)]     # 3 x (TH+2, W, Cin)

    if use_fat_k:
        # Tiny-Cin path: one fat-K matmul (K = 9*Cin).
        taps = [cols[kw][kh:kh + TH] for kh in range(3) for kw in range(3)]
        patch = jnp.concatenate(taps, axis=-1).reshape(TH * W, 9 * Cin)
        acc = jnp.dot(patch, w_ref[...].reshape(9 * Cin, Cp),
                      preferred_element_type=jnp.float32)
    else:
        # Realistic-Cin path: nine accumulated K=Cin matmuls, f32 accumulator.
        acc = None
        for kh in range(3):
            for kw in range(3):
                tap = cols[kw][kh:kh + TH].reshape(TH * W, Cin)
                p = jnp.dot(tap, w_ref[kh * 3 + kw],
                            preferred_element_type=jnp.float32)
                acc = p if acc is None else acc + p

    # Epilogue (f32): folded BN bias + ReLU, then lane-dense store.
    y = jnp.maximum(acc + b_ref[...], 0.0)
    o_ref[...] = y.reshape(1, TH, W, Cp).astype(o_ref.dtype)


def conv_bn_relu(x_nchw, weight_oihw, gamma, beta, running_mean, running_var,
                 eps=1e-5, *, tile_h=None, compute_dtype=jnp.bfloat16,
                 out_dtype=jnp.bfloat16, use_fat_k=None,
                 vmem_limit_bytes=48 * 1024 * 1024):
    """Forward pass matching ConvBnReLU(kernel_size=3, stride=1, pad=1).eval()."""
    N, Cin, H, W = x_nchw.shape
    Cout = weight_oihw.shape[0]
    assert weight_oihw.shape == (Cout, Cin, 3, 3), "only 3x3 conv implemented"

    if use_fat_k is None:
        use_fat_k = Cin < 64   # fat-K only pays off for very small Cin

    # H tile (1-row halo each side).  Cap TH*W so the f32 accumulator and the
    # output tile stay modest; raise vmem_limit_bytes on v5e/v6e for bigger tiles.
    if tile_h is None:
        cands = [th for th in range(1, H + 1) if H % th == 0 and th * W <= 2048]
        if not cands:
            raise ValueError(
                f"no automatic tile_h for W={W}; pass tile_h explicitly "
                "(TODO(synk): add a W tile axis with a 1-column halo)")
        tile_h = max(cands)
    assert H % tile_h == 0
    n_h = H // tile_h

    # Pad Cout to a lane-dense multiple of 128 (unmasked output stores).
    cout_p = ((Cout + LANES - 1) // LANES) * LANES

    # Fold BN (inference affine) into per-channel scale/bias; fold the scale
    # straight into the conv weights so the epilogue is just bias-add + ReLU.
    inv_std = 1.0 / jnp.sqrt(running_var.astype(jnp.float32) + eps)
    scale = gamma.astype(jnp.float32) * inv_std                       # (Cout,)
    bias = beta.astype(jnp.float32) - running_mean.astype(jnp.float32) * scale

    w_hwio = jnp.transpose(weight_oihw, (2, 3, 1, 0)).astype(jnp.float32) * scale
    w_hwio = jnp.pad(w_hwio, ((0, 0), (0, 0), (0, 0), (0, cout_p - Cout)))
    w_mat = w_hwio.reshape(9, Cin, cout_p).astype(compute_dtype)      # (9,Cin,Cp)
    bias_p = jnp.pad(bias, (0, cout_p - Cout)).reshape(1, cout_p)     # f32

    # NCHW -> NHWC (bf16) + 1-pixel zero pad.  No halo duplication in HBM.
    x_nhwc = jnp.transpose(x_nchw, (0, 2, 3, 1)).astype(compute_dtype)
    x_pad = jnp.pad(x_nhwc, ((0, 0), (1, 1), (1, 1), (0, 0)))

    in_bytes = jnp.dtype(compute_dtype).itemsize
    out_bytes = jnp.dtype(out_dtype).itemsize
    cost = pl.CostEstimate(
        flops=2 * N * H * W * 9 * Cin * cout_p,
        transcendentals=0,
        bytes_accessed=(x_pad.size * in_bytes + w_mat.size * in_bytes
                        + N * H * W * cout_p * out_bytes))

    kernel = functools.partial(_conv_bn_relu_kernel, use_fat_k=use_fat_k)

    out_nhwc = pl.pallas_call(
        kernel,
        out_shape=jax.ShapeDtypeStruct((N, H, W, cout_p), out_dtype),
        grid_spec=pltpu.PrefetchScalarGridSpec(
            num_scalar_prefetch=0,
            grid=(N, n_h),
            in_specs=[
                # whole padded image per batch elem; constant across r so it is
                # DMA'd once per n and the row window is sliced in-kernel.
                pl.BlockSpec((1, H + 2, W + 2, Cin), lambda n, r: (n, 0, 0, 0)),
                pl.BlockSpec((9, Cin, cout_p), lambda n, r: (0, 0, 0)),
                pl.BlockSpec((1, cout_p), lambda n, r: (0, 0)),
            ],
            out_specs=pl.BlockSpec((1, tile_h, W, cout_p),
                                   lambda n, r: (n, r, 0, 0)),
        ),
        compiler_params=pltpu.CompilerParams(
            dimension_semantics=("parallel", "parallel"),
            vmem_limit_bytes=vmem_limit_bytes),
        cost_estimate=cost,
    )(x_pad, w_mat, bias_p)

    # Drop Cout lane padding and return NCHW (single fused slice+transpose).
    return jnp.transpose(out_nhwc[..., :Cout], (0, 3, 1, 2))


def _reference(x_nchw, weight_oihw, gamma, beta, running_mean, running_var,
               eps=1e-5):
    conv = lax.conv_general_dilated(
        x_nchw, weight_oihw, window_strides=(1, 1), padding=((1, 1), (1, 1)),
        dimension_numbers=("NCHW", "OIHW", "NCHW"))
    scale = (gamma / jnp.sqrt(running_var + eps)).reshape(1, -1, 1, 1)
    bias = (beta - running_mean * gamma / jnp.sqrt(running_var + eps)
            ).reshape(1, -1, 1, 1)
    return jnp.maximum(conv * scale + bias, 0.0)


if __name__ == "__main__":
    key = jax.random.PRNGKey(0)
    k_x, k_w, k_g, k_b, k_m, k_v = jax.random.split(key, 6)

    N, Cin, Cout, H, W = 2, 4, 8, 16, 16

    x = jax.random.normal(k_x, (N, Cin, H, W), jnp.float32)
    weight = jax.random.normal(k_w, (Cout, Cin, 3, 3), jnp.float32) * 0.1
    gamma = 1.0 + 0.1 * jax.random.normal(k_g, (Cout,), jnp.float32)
    beta = 0.1 * jax.random.normal(k_b, (Cout,), jnp.float32)
    running_mean = 0.1 * jax.random.normal(k_m, (Cout,), jnp.float32)
    running_var = jnp.abs(jax.random.normal(k_v, (Cout,), jnp.float32)) + 0.5

    ref = _reference(x, weight, gamma, beta, running_mean, running_var)

    # (a) small-Cin fat-K path, bf16 output, tile_h=8 -> grid=(2,2) exercises
    #     the in-kernel dynamic row-window (halo) path.
    out_a = conv_bn_relu(x, weight, gamma, beta, running_mean, running_var,
                         tile_h=8)
    out_a = jax.block_until_ready(out_a)
    assert out_a.shape == (N, Cout, H, W)
    err_a = float(jnp.max(jnp.abs(out_a.astype(jnp.float32) - ref)))
    assert jnp.allclose(out_a.astype(jnp.float32), ref, atol=5e-2, rtol=5e-2), err_a

    # (b) accumulated-matmul path (default for realistic Cin), f32 output,
    #     single H tile.
    out_b = conv_bn_relu(x, weight, gamma, beta, running_mean, running_var,
                         use_fat_k=False, out_dtype=jnp.float32)
    out_b = jax.block_until_ready(out_b)
    err_b = float(jnp.max(jnp.abs(out_b - ref)))
    assert jnp.allclose(out_b, ref, atol=5e-2, rtol=5e-2), err_b

    print("KERNEL_OK")
</pallas_src>

<mosaic_0001>
module attributes {stable_mosaic.version = 11 : i64} {
  func.func @_conv_bn_relu_kernel(%arg0: i32, %arg1: i32, %arg2: memref<1x18x18x4xbf16, #tpu.memory_space<vmem>>, %arg3: memref<9x4x128xbf16, #tpu.memory_space<vmem>>, %arg4: memref<1x128xf32, #tpu.memory_space<vmem>>, %arg5: memref<1x8x16x128xbf16, #tpu.memory_space<vmem>>) attributes {dimension_semantics = [#tpu.dimension_semantics<parallel>, #tpu.dimension_semantics<parallel>], iteration_bounds = array<i64: 2, 2>, scalar_prefetch = 0 : i64, scratch_operands = 0 : i64, tpu.core_type = #tpu.core_type<tc>, window_params = [{transform_indices = @transform_0, window_bounds = array<i64: 1, 18, 18, 4>}, {pipeline_mode = #tpu.pipeline_mode<synchronous>, transform_indices = @transform_1, window_bounds = array<i64: 9, 4, 128>}, {pipeline_mode = #tpu.pipeline_mode<synchronous>, transform_indices = @transform_2, window_bounds = array<i64: 1, 128>}, {transform_indices = @transform_3, window_bounds = array<i64: 1, 8, 16, 128>}]} {
    %c8_i32 = arith.constant 8 : i32
    %0 = arith.muli %arg1, %c8_i32 : i32
    %1 = tpu.assume_multiple %0, 8 : i32
    %c0 = arith.constant 0 : index
    %2 = arith.index_cast %1 : i32 to index
    %c0_0 = arith.constant 0 : index
    %c0_1 = arith.constant 0 : index
    %3 = vector.load %arg2[%c0, %2, %c0_0, %c0_1] : memref<1x18x18x4xbf16, #tpu.memory_space<vmem>>, vector<1x10x18x4xbf16>
    %4 = vector.shape_cast %3 : vector<1x10x18x4xbf16> to vector<10x18x4xbf16>
    %5 = vector.extract_strided_slice %4 {offsets = [0, 0, 0], sizes = [10, 16, 4], strides = [1, 1, 1]} : vector<10x18x4xbf16> to vector<10x16x4xbf16>
    %6 = vector.extract_strided_slice %4 {offsets = [0, 1, 0], sizes = [10, 16, 4], strides = [1, 1, 1]} : vector<10x18x4xbf16> to vector<10x16x4xbf16>
    %7 = vector.extract_strided_slice %4 {offsets = [0, 2, 0], sizes = [10, 16, 4], strides = [1, 1, 1]} : vector<10x18x4xbf16> to vector<10x16x4xbf16>
    %8 = vector.extract_strided_slice %5 {offsets = [0, 0, 0], sizes = [8, 16, 4], strides = [1, 1, 1]} : vector<10x16x4xbf16> to vector<8x16x4xbf16>
    %9 = vector.extract_strided_slice %6 {offsets = [0, 0, 0], sizes = [8, 16, 4], strides = [1, 1, 1]} : vector<10x16x4xbf16> to vector<8x16x4xbf16>
    %10 = vector.extract_strided_slice %7 {offsets = [0, 0, 0], sizes = [8, 16, 4], strides = [1, 1, 1]} : vector<10x16x4xbf16> to vector<8x16x4xbf16>
    %11 = vector.extract_strided_slice %5 {offsets = [1, 0, 0], sizes = [8, 16, 4], strides = [1, 1, 1]} : vector<10x16x4xbf16> to vector<8x16x4xbf16>
    %12 = vector.extract_strided_slice %6 {offsets = [1, 0, 0], sizes = [8, 16, 4], strides = [1, 1, 1]} : vector<10x16x4xbf16> to vector<8x16x4xbf16>
    %13 = vector.extract_strided_slice %7 {offsets = [1, 0, 0], sizes = [8, 16, 4], strides = [1, 1, 1]} : vector<10x16x4xbf16> to vector<8x16x4xbf16>
    %14 = vector.extract_strided_slice %5 {offsets = [2, 0, 0], sizes = [8, 16, 4], strides = [1, 1, 1]} : vector<10x16x4xbf16> to vector<8x16x4xbf16>
    %15 = vector.extract_strided_slice %6 {offsets = [2, 0, 0], sizes = [8, 16, 4], strides = [1, 1, 1]} : vector<10x16x4xbf16> to vector<8x16x4xbf16>
    %16 = vector.extract_strided_slice %7 {offsets = [2, 0, 0], sizes = [8, 16, 4], strides = [1, 1, 1]} : vector<10x16x4xbf16> to vector<8x16x4xbf16>
    %17 = tpu.concatenate %8, %9, %10, %11, %12, %13, %14, %15, %16 in 2 : vector<8x16x4xbf16>, vector<8x16x4xbf16>, vector<8x16x4xbf16>, vector<8x16x4xbf16>, vector<8x16x4xbf16>, vector<8x16x4xbf16>, vector<8x16x4xbf16>, vector<8x16x4xbf16>, vector<8x16x4xbf16> -> vector<8x16x36xbf16>
    %18 = vector.shape_cast %17 : vector<8x16x36xbf16> to vector<128x36xbf16>
    %c0_2 = arith.constant 0 : index
    %c0_3 = arith.constant 0 : index
    %c0_4 = arith.constant 0 : index
    %19 = vector.load %arg3[%c0_2, %c0_3, %c0_4] : memref<9x4x128xbf16, #tpu.memory_space<vmem>>, vector<9x4x128xbf16>
    %20 = vector.shape_cast %19 : vector<9x4x128xbf16> to vector<36x128xbf16>
    %cst = arith.constant dense<0.000000e+00> : vector<128x128xf32>
    %21 = tpu.matmul %18, %20, %cst {dimension_numbers = #tpu.dot_dimension_numbers<[1], [0], [0], [1], [0, 0, 1, 1], [], []>} : vector<128x36xbf16>, vector<36x128xbf16>, vector<128x128xf32> -> vector<128x128xf32>
    %c0_5 = arith.constant 0 : index
    %c0_6 = arith.constant 0 : index
    %22 = vector.load %arg4[%c0_5, %c0_6] : memref<1x128xf32, #tpu.memory_space<vmem>>, vector<1x128xf32>
    %23 = vector.broadcast %22 : vector<1x128xf32> to vector<128x128xf32>
    %24 = arith.addf %21, %23 : vector<128x128xf32>
    %cst_7 = arith.constant 0.000000e+00 : f32
    %25 = vector.broadcast %cst_7 : f32 to vector<128x128xf32>
    %26 = arith.maximumf %24, %25 : vector<128x128xf32>
    %27 = vector.shape_cast %26 : vector<128x128xf32> to vector<1x8x16x128xf32>
    %28 = arith.truncf %27 : vector<1x8x16x128xf32> to vector<1x8x16x128xbf16>
    %c0_8 = arith.constant 0 : index
    %c0_9 = arith.constant 0 : index
    %c0_10 = arith.constant 0 : index
    %c0_11 = arith.constant 0 : index
    %29 = vector.load %arg5[%c0_8, %c0_9, %c0_10, %c0_11] : memref<1x8x16x128xbf16, #tpu.memory_space<vmem>>, vector<1x8x16x128xbf16>
    tpu.vector_store %arg5[%c0_8, %c0_9, %c0_10, %c0_11], %28 {strides = array<i32>} : memref<1x8x16x128xbf16, #tpu.memory_space<vmem>>, vector<1x8x16x128xbf16>,
    return
  }
  func.func @transform_0(%arg0: i32, %arg1: i32) -> (i32, i32, i32, i32) {
    %c0_i32 = arith.constant 0 : i32
    %c0_i32_0 = arith.constant 0 : i32
    %c0_i32_1 = arith.constant 0 : i32
    %c0_i32_2 = arith.constant 0 : i32
    return %arg0, %c0_i32, %c0_i32_0, %c0_i32_1 : i32, i32, i32, i32
  }
  func.func @transform_1(%arg0: i32, %arg1: i32) -> (i32, i32, i32) {
    %c0_i32 = arith.constant 0 : i32
    %c0_i32_0 = arith.constant 0 : i32
    %c0_i32_1 = arith.constant 0 : i32
    %c0_i32_2 = arith.constant 0 : i32
    return %c0_i32, %c0_i32_0, %c0_i32_1 : i32, i32, i32
  }
  func.func @transform_2(%arg0: i32, %arg1: i32) -> (i32, i32) {
    %c0_i32 = arith.constant 0 : i32
    %c0_i32_0 = arith.constant 0 : i32
    %c0_i32_1 = arith.constant 0 : i32
    return %c0_i32, %c0_i32_0 : i32, i32
  }
  func.func @transform_3(%arg0: i32, %arg1: i32) -> (i32, i32, i32, i32) {
    %c0_i32 = arith.constant 0 : i32
    %c0_i32_0 = arith.constant 0 : i32
    %c0_i32_1 = arith.constant 0 : i32
    return %arg0, %arg1, %c0_i32, %c0_i32_0 : i32, i32, i32, i32
  }
}

</mosaic_0001>

<bundles_post_ra>
// kernel: tpu_custom_call.1
= control target key start
LH: loop header
LB: loop body
LE: loop exit
PB: predicated region body
PF: predicated region fallthrough
CT: control target
= control target key end

     0   :  { %8 = vsyncpa [#allocation3], 0  ;;  %s2001_s0 = inlined_call_operand.vmem [shape: bf16[2,18,18,4], index: 0, kind: input, shape index: {}]   ;;  %s2002_s1 = inlined_call_operand.vmem [shape: bf16[9,4,128], index: 1, kind: input, shape index: {}]   ;;  %s2003_s2 = inlined_call_operand.vmem [shape: f32[1,128], index: 2, kind: input, shape index: {}]   ;;  %s2004_s3 = inlined_call_operand.hbm [shape: bf16[2,16,16,128], index: 3, kind: output, shape index: {}]  }
   0x1   :  { %10 = vsyncpa [#allocation3 + $0x1], 0  ;;  %s1490_s12 = smov 0   ;;  %s1492_s13 = smov 0  }
   0x2   :  { %s1494_s14 = smov 0   ;;  %s1496_s15 = smov 0  }
   0x3   :  { %s1498_s16 = smov 0   ;;  %s1500_s17 = smov 0  }
   0x4   :  { %s1502_s18 = smov 0   ;;  %s1504_s19 = smov 0  }
   0x5 LB: > { %s1092_s20 = sadd.s32 4294967295, %s1457_s19   ;;  %s1093_s21 = sadd.s32 4294967294, %s1457_s19   ;;  %s1457_s19 = sphi %s1504_s19, %s16_s19   ;;  %s1453_s18 = sphi %s1502_s18, %s2013_s18   ;;  %s1449_s17 = sphi %s1500_s17, %s2012_s17   ;;  %s1445_s16 = sphi %s1498_s16, %s2011_s16   ;;  %s1441_s15 = sphi %s1496_s15, %s2010_s15   ;;  %s1437_s14 = sphi %s1494_s14, %s2009_s14   ;;  %s1433_s13 = sphi %s1492_s13, %s2008_s13   ;;  %s1429_s12 = sphi %s1490_s12, %s2007_s12  }
   0x6   : > { %s25_s22 = sadd.s32 1, %s1449_s17  ;;  %s28_s23 = sadd.s32 1, %s1453_s18 }
   0x7   : > { %p26_p0 = scmp.ge.s32.totalorder %s25_s22, 2  ;;  %p115_p1 = scmp.ne.s32.totalorder %s1437_s14, %s1433_s13 }
   0x8   : > { %p116_p2 = scmp.eq.s32.totalorder %s1092_s20, 3  ;;  %p121_p5 = scmp.ne.s32.totalorder %s1433_s13, %s1429_s12 }
   0x9   : > { %s2015_s22 = smov (%p26_p0, %s25_s22), 0  ;;  %s2017_s23 = smov (!%p26_p0, %s28_s23), %s1453_s18 }
   0xa   : > { %s101_s24 = ssub.s32 %s1449_s17, %s2015_s22  ;;  %p1541_p3 = por %p116_p2, %p115_p1 }
   0xb   : > { %p30_p4 = scmp.ge.s32.totalorder %s2017_s23, 2  ;;  %p122_p6 = scmp.eq.s32.totalorder %s1093_s21, 3 }
   0xc   : > { %p1096_p7 = scmp.ge.s32.totalorder %s1457_s19, 1  ;;  %p154_p9 = scmp.lt.s32.totalorder %s1457_s19, 5 }
   0xd   : > { %s2019_s23 = smov (%p30_p4, %s2017_s23), 0  ;;  %p1550_p8 = por %p122_p6, %p121_p5 }
   0xe   : > { %s100_s27 = ssub.s32 %s1453_s18, %s2019_s23  ;;  %s105_s28 = sadd.s32 1, %s1437_s14 }
   0xf   : > { %s102_s29 = sor.u32 %s101_s24, %s100_s27  ;;  %p155_p10 = pnand %p1096_p7, %p154_p9 }
  0x10   : > { %p103_p11 = scmp.eq.s32.totalorder %s102_s29, 0  ;;  %p178_p12 = scmp.lt.s32.totalorder (!%p155_p10), %s1445_s16, 1  ;;  %vm396_vm0 = vcmask (!%p155_p10), 1046528   ;;  %vm283_vm1 = vsmask.f32 (!%p155_p10), 7424  ;;  %vm800_vm2 = vcmask (!%p155_p10), 1041408  }
  0x11   : > { %158 = sbr.rel (%p155_p10) target bundleno = 508 (0x1fc), region = 32  ;;  %s1459_s11 = smov (!%p155_p10), 12   ;;  %vm579_vm3 = vcmask (!%p155_p10), 31744   ;;  %vm596_vm4 = vcmask (!%p155_p10), 64512   ;;  %vm630_vm5 = vcmask (!%p155_p10), 130048   ;;  %vm613_vm6 = vcmask (!%p155_p10), 97280  }
  0x12   : > { %s1559_s30 = scalar_select %p103_p11, %s1437_s14, %s105_s28  }
  0x13   : > { %s1155_s5 = smul.u32 (!%p155_p10), 96, %s1441_s15  ;;  %s1460_s20 = smov (!%p155_p10), 8   ;;  %vm647_vm7 = vcmask (!%p155_p10), 162816   ;;  %vm664_vm8 = vcmask (!%p155_p10), 195584   ;;  %vm681_vm9 = vcmask (!%p155_p10), 228352   ;;  %vm698_vm10 = vcmask (!%p155_p10), 261120  }
  0x14   : > { %s1461_s21 = smov (!%p155_p10), 4   ;;  %s1462_s24 = smov (!%p155_p10), 16   ;;  %vm783_vm11 = vcmask (!%p155_p10), 293888  }
  0x15   : > { %s1463_s27 = smov (!%p155_p10), 20   ;;  %s1465_s8 = smov (!%p155_p10), 24  }
  0x16   : > { %s1466_s28 = smov (!%p155_p10), 28   ;;  %s1172_s7 = sshll.u32 (!%p155_p10), %s1441_s15, 4 }
  0x18   : > { %s179_s4 = scalar_select %p178_p12, %s1445_s16, 1 }
  0x1a   : > { %s1261_s6 = smul.u32 216, %s179_s4 }
  0x1c   : > { %s182_s9 = scalar_lea.vmem %s2001_s0, %s1261_s6 }
  0x1d   : > { %s1567_s10 = scalar_lea.vmem %s182_s9, %s1155_s5  ;;  %s1467_s5 = smov 32  }
  0x1e   : > { %v1570_v0 = vld [vmem:[%s1567_s10 + $0x3c] sm:$0xff]   ;;  %v1573_v1 = vld [vmem:[%s1567_s10 + $0xc] sm:$0xff]   ;;  %v1346_v3 = vld [vmem:[%s1567_s10 + $0x38] ss:$0 sps:$4 sm:$0x11]  }
  0x1f   : > { %450 = vrot.lane.b32.xlu1 %v1570_v0, %s1459_s11  ;;  %442 = vrot.lane.b32.xlu0 %v1573_v1, %s1459_s11  ;;  %v1580_v2 = vld [vmem:[%s1567_s10 + $0x30] sm:$0xff]   ;;  %v1584_v4 = vld [vmem:[%s1567_s10] sm:$0xff]   ;;  %v412_v5 = vrot.slane %v1570_v0, 1  ;;  %v410_v7 = vrot.slane %v1346_v3, 1  ;;  %v400_v9 = vrot.slane %v1573_v1, 1  ;;  %v297_v16 = vshrl.u32 %v1573_v1, 16 }
  0x20   : > { %v409_v6 = vrot.slane %v1580_v2, 1  ;;  %v1348_v8 = vld [vmem:[%s1567_s10 + $0x8] ss:$0 sps:$4 sm:$0x11]   ;;  %v397_v10 = vrot.slane %v1584_v4, 1  ;;  %v299_v17 = vshll.u32 %v1573_v1, 16 }
  0x21   : > { %v1349_v11 = vld [vmem:[%s1567_s10 + $0x44] ss:$0 sps:$4 sm:$0x11]   ;;  %v398_v13 = vrot.slane %v1348_v8, 1  ;;  %v285_v18 = vshrl.u32 %v1584_v4, 16  ;;  %v287_v22 = vshll.u32 %v1584_v4, 16 }
  0x22   : > { %v1593_v12 = vsel %vm396_vm0, %v409_v6, %v410_v7  ;;  %v1350_v14 = vld [vmem:[%s1567_s10 + $0x14] ss:$0 sps:$4 sm:$0x11]   ;;  %v413_v15 = vrot.slane %v1349_v11, 1  ;;  %v301_v24 = vrot.slane %v299_v17, 1  ;;  %v292_v25 = vshll.u32 %v1348_v8, 16 }
  0x23   : > { %429 = vrot.lane.b32.xlu1 %v1593_v12, %s1460_s20  ;;  %v399_v19 = vsel %vm396_vm0, %v397_v10, %v398_v13  ;;  %v401_v20 = vrot.slane %v1350_v14, 1  ;;  %v304_v21 = vshll.u32 %v1350_v14, 16  ;;  %v345_v26 = vshrl.u32 %v1570_v0, 16  ;;  %v1617_v39 = vld [vmem:[%s1567_s10 + $0x48] sm:$0xff]   ;;  %v1624_v46 = vld [vmem:[%s1567_s10 + $0x18] sm:$0xff]   ;;  %v1647_v57 = vld [vmem:[%s1567_s10 + $0x60] sm:$0xff]  }
  0x24   : > { %421 = vrot.lane.b32.xlu0 %v399_v19, %s1460_s20  ;;  %v1605_v23 = vsel %vm396_vm0, %v412_v5, %v413_v15  ;;  %v289_v29 = vrot.slane %v287_v22, 1  ;;  %v347_v30 = vshll.u32 %v1570_v0, 16  ;;  %v302_v31 = vor.u32 %v301_v24, %v297_v16  ;;  %v1628_v47 = vld [vmem:[%s1567_s10 + $0x50] ss:$0 sps:$4 sm:$0x11]  }
  0x25   : > { %v1609_v27 = vsel %vm396_vm0, %v400_v9, %v401_v20  ;;  %v306_v28 = vrot.slane %v304_v21, 1  ;;  %v294_v32 = vrot.slane %v292_v25, 1  ;;  %v352_v33 = vshll.u32 %v1349_v11, 16  ;;  %v1636_v51 = vld [vmem:[%s1567_s10 + $0x20] ss:$0 sps:$4 sm:$0x11]  }
  0x26   : > { %v333_v34 = vshrl.u32 %v1580_v2, 16  ;;  %v290_v35 = vor.u32 %v289_v29, %v285_v18  ;;  %v349_v36 = vrot.slane %v347_v30, 1  ;;  %v335_v37 = vshll.u32 %v1580_v2, 16  ;;  %v1656_v61 = vld [vmem:[%s1567_s10 + $0x6c] sm:$0xff]  }
  0x27   : > { %431 = vrot.lane.b32.xlu1 %v1605_v23, %s1460_s20  ;;  %v340_v38 = vshll.u32 %v1346_v3, 16  ;;  %v307_v40 = vsel %vm283_vm1, %v302_v31, %v306_v28  ;;  %v354_v41 = vrot.slane %v352_v33, 1  ;;  %v359_v50 = vshll.u32 %v1617_v39, 16  ;;  %v1360_v3 = vld [vmem:[%s1567_s10 + $0x68] ss:$0 sps:$4 sm:$0x11]  }
  0x28   : > { %423 = vrot.lane.b32.xlu0 %v1609_v27, %s1460_s20  ;;  %v295_v42 = vsel %vm283_vm1, %v290_v35, %v294_v32  ;;  %v350_v43 = vor.u32 %v349_v36, %v345_v26  ;;  %v337_v44 = vrot.slane %v335_v37, 1  ;;  %v311_v53 = vshll.u32 %v1624_v46, 16  ;;  %v1362_v15 = vld [vmem:[%s1567_s10 + $0x74] ss:$0 sps:$4 sm:$0x11]  }
  0x29   : > { %v342_v45 = vrot.slane %v340_v38, 1  ;;  %v357_v54 = vshrl.u32 %v1617_v39, 16  ;;  %v361_v55 = vrot.slane %v359_v50, 1  ;;  %v364_v56 = vshll.u32 %v1628_v47, 16  ;;  %v716_v50 = vld [vmem:[%s2002_s1 + $0x2] sm:$0x3] }
  0x2a   : > { %v1631_v48 = vsel %vm283_vm1, %v350_v43, %v354_v41  ;;  %v338_v49 = vor.u32 %v337_v44, %v333_v34  ;;  %v316_v58 = vshll.u32 %v1636_v51, 16  ;;  %v309_v59 = vshrl.u32 %v1624_v46, 16  ;;  %v1708_v43 = vld [vmem:[%s1567_s10 + $0x24] sm:$0xff]  }
  0x2b   : > { %382 = vrot.lane.b32.xlu1 %v307_v40, %s1461_s21  ;;  %v313_v60 = vrot.slane %v311_v53, 1  ;;  %v362_v62 = vor.u32 %v361_v55, %v357_v54  ;;  %v366_v63 = vrot.slane %v364_v56, 1  ;;  %v462_v5 = vshrl.u32 %v1647_v57, 16  ;;  %v1728_v55 = vld [vmem:[%s1567_s10 + $0x5c] ss:$0 sps:$4 sm:$0x11]  }
  0x2c   : > { %380 = vrot.lane.b32.xlu0 %v295_v42, %s1461_s21  ;;  %v1639_v52 = vsel %vm283_vm1, %v338_v49, %v342_v45  ;;  %v464_v6 = vshll.u32 %v1647_v57, 16  ;;  %v318_v7 = vrot.slane %v316_v58, 1  ;;  %v489_v8 = vrot.slane %v1647_v57, 1  ;;  %v1703_v42 = vld [vmem:[%s1567_s10 + $0x54] sm:$0xff]   ;;  %v715_v49 = vld [vmem:[%s2002_s1] sm:$0x3] }
  0x2d   : > { %v314_v9 = vor.u32 %v313_v60, %v309_v59  ;;  %v469_v11 = vshll.u32 %v1360_v3, 16  ;;  %v533_v13 = vshrl.u32 %v1656_v61, 16  ;;  %v490_v14 = vrot.slane %v1360_v3, 1  ;;  %v1734_v59 = vld [vmem:[%s1567_s10 + $0x2c] ss:$0 sps:$4 sm:$0x11]  }
  0x2e   : > { %v466_v10 = vrot.slane %v464_v6, 1  ;;  %v535_v16 = vshll.u32 %v1656_v61, 16  ;;  %v560_v17 = vrot.slane %v1656_v61, 1  ;;  %v1671_v18 = vsel %vm283_vm1, %v362_v62, %v366_v63  ;;  %v719_v3 = vld [vmem:[%s2002_s1 + $0x8] sm:$0x3] }
  0x2f   : > { %390 = vrot.lane.b32.xlu1 %v1631_v48, %s1461_s21  ;;  %v471_v20 = vrot.slane %v469_v11, 1  ;;  %v1675_v21 = vsel %vm396_vm0, %v489_v8, %v490_v14  ;;  %v540_v24 = vshll.u32 %v1362_v15, 16  ;;  %v561_v25 = vrot.slane %v1362_v15, 1  ;;  %v721_v6 = vld [vmem:[%s2002_s1 + $0xc] sm:$0x3] }
  0x30   : > { %388 = vrot.lane.b32.xlu0 %v1639_v52, %s1461_s21  ;;  %v467_v19 = vor.u32 %v466_v10, %v462_v5  ;;  %v537_v22 = vrot.slane %v535_v16, 1  ;;  %v1678_v26 = vsel %vm283_vm1, %v314_v9, %v318_v7  ;;  %v415_v32 = vrot.slane %v1617_v39, 1  ;;  %v720_v5 = vld [vmem:[%s2002_s1 + $0xa] sm:$0x3]  ;;  %v722_v8 = vld [vmem:[%s2002_s1 + $0xe] sm:$0x3] }
  0x31   : > { %v542_v30 = vrot.slane %v540_v24, 1  ;;  %v1686_v31 = vsel %vm396_vm0, %v560_v17, %v561_v25  ;;  %v416_v33 = vrot.slane %v1628_v47, 1  ;;  %v403_v35 = vrot.slane %v1624_v46, 1 }
  0x32   : > { %v1681_v28 = vsel %vm283_vm1, %v467_v19, %v471_v20  ;;  %v538_v29 = vor.u32 %v537_v22, %v533_v13  ;;  %v404_v36 = vrot.slane %v1636_v51, 1  ;;  %v1464_v37 = vmov 1983009808   ;;  %v718_v51 = vld [vmem:[%s2002_s1 + $0x6] sm:$0x3] }
  0x33   : > { %452 = vrot.lane.b32.xlu1 %v1617_v39, %s1459_s11  ;;  %v743_v38 = vunpack.c.l.s4 %v1464_v37  ;;  %v1700_v41 = vsel %vm396_vm0, %v415_v32, %v416_v33  ;;  %v740_v53 = vcombine.low %v715_v49, %v716_v50  ;;  %v371_v56 = vshll.u32 %v1703_v42, 16  ;;  %v1123_v33 = vld.sshfl [vmem:[%s2002_s1 + $0x10] sm:$0x3 pattern:$0x76325410] }
  0x34   : > { %444 = vrot.lane.b32.xlu0 %v1624_v46, %s1459_s11  ;;  %v1693_v34 = vsel %vm283_vm1, %v538_v29, %v542_v30  ;;  %v1711_v47 = vsel %vm396_vm0, %v403_v35, %v404_v36  ;;  %v323_v60 = vshll.u32 %v1708_v43, 16  ;;  %v369_v7 = vshrl.u32 %v1703_v42, 16 }
  0x35   : > { %v744_v44 = vunpack.c.0.s8 %v743_v38  ;;  %v757_v9 = vcombine.low %v719_v3, %v720_v5  ;;  %v373_v10 = vrot.slane %v371_v56, 1  ;;  %v376_v11 = vshll.u32 %v1728_v55, 16 }
  0x36   : > { %v758_v14 = vcombine.low %v721_v6, %v722_v8  ;;  %v321_v16 = vshrl.u32 %v1708_v43, 16  ;;  %v325_v17 = vrot.slane %v323_v60, 1  ;;  %v328_v19 = vshll.u32 %v1734_v59, 16 }
  0x37   : > { %481 = vrot.lane.b32.xlu1 %v1631_v48, %s1462_s24  ;;  %v374_v22 = vor.u32 %v373_v10, %v369_v7  ;;  %v378_v24 = vrot.slane %v376_v11, 1  ;;  %v802_v35 = vsel %vm800_vm2, %v1123_v33, 0  ;;  %v418_v37 = vrot.slane %v1703_v42, 1 }
  0x38   : > { %473 = vrot.lane.b32.xlu0 %v307_v40, %s1462_s24  ;;  %v745_v40 = vlaneseq  ;;  %v326_v29 = vor.u32 %v325_v17, %v321_v16  ;;  %v330_v30 = vrot.slane %v328_v19, 1  ;;  %v419_v38 = vrot.slane %v1728_v55, 1 }
  0x39   : > { %v379_v32 = vsel %vm283_vm1, %v374_v22, %v378_v24 }
  0x3a   : > { %v746_v45 = vshrl.u32 %v745_v40, 7  ;;  %v331_v36 = vsel %vm283_vm1, %v326_v29, %v330_v30  ;;  %v406_v40 = vrot.slane %v1708_v43, 1 }
  0x3b   : > { %483 = vrot.lane.b32.xlu1 %v1671_v18, %s1462_s24 }
  0x3c   : > { %475 = vrot.lane.b32.xlu0 %v1678_v26, %s1462_s24  ;;  %v747_v54 = vsub.s32 %v744_v44, %v746_v45  ;;  %v407_v44 = vrot.slane %v1734_v59, 1  ;;  %v420_v45 = vsel %vm396_vm0, %v418_v37, %v419_v38 }
  0x3e   : > { %v748_v62 = vrot.slane %v740_v53, %v747_v54  ;;  %v765_v15 = vrot.slane %v757_v9, %v747_v54  ;;  %v772_v20 = vrot.slane %v758_v14, %v747_v54  ;;  %v408_v49 = vsel %vm396_vm0, %v406_v40, %v407_v44 }
  0x3f   : > { %500 = vrot.lane.b32.xlu1 %v1605_v23, %s1463_s27 }
  0x40   : > { %492 = vrot.lane.b32.xlu0 %v1609_v27, %s1463_s27  ;;  %v717_v27 = vld [vmem:[%s2002_s1 + $0x4] sm:$0x3]  ;;  %v773_v25 = vcombine.low %v765_v15, %v772_v20 }
  0x41   : > { %v741_v58 = vcombine.low %v717_v27, %v718_v51 }
  0x43   : > { %502 = vrot.lane.b32.xlu1 %v1700_v41, %s1463_s27  ;;  %v755_v63 = vrot.slane %v741_v58, %v747_v54 }
  0x44   : > { %494 = vrot.lane.b32.xlu0 %v1711_v47, %s1463_s27 }
  0x45   : > { %v756_v13 = vcombine.low %v748_v62, %v755_v63 }
  0x47   : > { %521 = vrot.lane.b32.xlu1 %v1617_v39, %s1465_s8  ;;  %1231 = vmatprep.subr.bf16.mxu0 %v756_v13 }
  0x48   : > { %513 = vrot.lane.b32.xlu0 %v1624_v46, %s1465_s8  ;;  %1253 = vmatprep.subr.bf16.mxu1 %v756_v13 }
  0x49   : > { %1232 = vmatpush3.bf16.msra.mxu0 %v756_v13  ;;  %1256 = vmatpush3.bf16.msra.mxu1 %v756_v13 }
  0x4a   : > { %1233 = vmatprep.subr.bf16.mxu0 %v773_v25  ;;  %1254 = vmatprep.subr.bf16.mxu1 %v773_v25 }
  0x4b   : > { %523 = vrot.lane.b32.xlu1 %v1703_v42, %s1465_s8 }
  0x4c   : > { %515 = vrot.lane.b32.xlu0 %v1708_v43, %s1465_s8 }
  0x4d   : > { %1234 = vmatpush3.bf16.msra.mxu0 %v773_v25  ;;  %1257 = vmatpush3.bf16.msra.mxu1 %v773_v25 }
  0x4e   : > { %1259 = vmatprep.subr.msk.bf16.mxu0 %vm800_vm2, %v1123_v33  ;;  %1260 = vmatprep.subr.msk.bf16.mxu1 %vm800_vm2, %v1123_v33 }
  0x4f   : > { %552 = vrot.lane.b32.xlu1 %v1671_v18, %s1466_s28 }
  0x50   : > { %544 = vrot.lane.b32.xlu0 %v1678_v26, %s1466_s28 }
  0x51   : > { %1236 = vmatpush3.bf16.msra.mxu0 %v802_v35  ;;  %1258 = vmatpush3.bf16.msra.mxu1 %v802_v35 }
  0x53   : > { %554 = vrot.lane.b32.xlu1 %v379_v32, %s1466_s28 }
  0x54   : > { %546 = vrot.lane.b32.xlu0 %v331_v36, %s1466_s28 }
  0x57   : > { %571 = vrot.lane.b32.xlu1 %v1700_v41, %s1467_s5 }
  0x58   : > { %563 = vrot.lane.b32.xlu0 %v1711_v47, %s1467_s5 }
  0x5b   : > { %392 = vrot.lane.b32.xlu1 %v1671_v18, %s1461_s21 }
  0x5c   : > { %384 = vrot.lane.b32.xlu0 %v1678_v26, %s1461_s21 }
  0x5f   : > { %573 = vrot.lane.b32.xlu1 %v420_v45, %s1467_s5 }
  0x60   : > { %565 = vrot.lane.b32.xlu0 %v408_v49, %s1467_s5 }
  0x63   : > { %394 = vrot.lane.b32.xlu1 %v379_v32, %s1461_s21 }
  0x64   : > { %386 = vrot.lane.b32.xlu0 %v331_v36, %s1461_s21 }
  0x67   : > { %433 = vrot.lane.b32.xlu1 %v1700_v41, %s1460_s20 }
  0x68   : > { %425 = vrot.lane.b32.xlu0 %v1711_v47, %s1460_s20 }
  0x6b   : > { %435 = vrot.lane.b32.xlu1 %v420_v45, %s1460_s20 }
  0x6c   : > { %427 = vrot.lane.b32.xlu0 %v408_v49, %s1460_s20 }
  0x6f   : > { %454 = vrot.lane.b32.xlu1 %v1703_v42, %s1459_s11 }
  0x70   : > { %446 = vrot.lane.b32.xlu0 %v1708_v43, %s1459_s11 }
  0x73   : > { %456 = vrot.lane.b32.xlu1 %v1647_v57, %s1459_s11 }
  0x74   : > { %448 = vrot.lane.b32.xlu0 %v1580_v2, %s1459_s11  ;;  %s1468_s11 = smov [#allocation2]  }
  0x75   : > { %s1367_s20 = sshll.u32 %s1468_s11, 4  ;;  %s1368_s20 = int_to_ptr.vmem [resolvable:$false] %s1367_s20 }
  0x77   : > { %485 = vrot.lane.b32.xlu1 %v379_v32, %s1462_s24 }
  0x78   : > { %477 = vrot.lane.b32.xlu0 %v331_v36, %s1462_s24 }
  0x7b   : > { %487 = vrot.lane.b32.xlu1 %v1681_v28, %s1462_s24 }
  0x7c   : > { %479 = vrot.lane.b32.xlu0 %v1639_v52, %s1462_s24  ;;  %s175_s24 = sand.u32 1, %s1433_s13  }
  0x7d   : > { %s1948_s4 = scalar_lea.sflag [#allocation3], %s175_s24 }
  0x7f   : > { %504 = vrot.lane.b32.xlu1 %v420_v45, %s1463_s27 }
  0x80   : > { %496 = vrot.lane.b32.xlu0 %v408_v49, %s1463_s27 }
  0x83   : > { %506 = vrot.lane.b32.xlu1 %v1675_v21, %s1463_s27 }
  0x84   : > { %498 = vrot.lane.b32.xlu0 %v1593_v12, %s1463_s27  ;;  %s1097_s27 = sshll.u32 %s175_s24, 6 }
  0x85   : > { %s1926_s6 = scalar_lea.vmem [#allocation2], %s1097_s27  ;;  %s1369_s27 = scalar_lea.vmem %s1368_s20, 2048 }
  0x87   : > { %525 = vrot.lane.b32.xlu1 %v1647_v57, %s1465_s8 }
  0x88   : > { %517 = vrot.lane.b32.xlu0 %v1580_v2, %s1465_s8 }
  0x8b   : > { %527 = vrot.lane.b32.xlu1 %v1656_v61, %s1465_s8 }
  0x8c   : > { %519 = vrot.lane.b32.xlu0 %v1570_v0, %s1465_s8  ;;  %s1151_s8 = sshll.u32 %s1445_s16, 5  ;;  %s1014_s16 = sshll.u32 %s1926_s6, 4  ;;  %s1942_s16 = int_to_ptr.vmem [resolvable:$true] %s1014_s16 }
  0x8d   : > { %s1011_s10 = sadd.s32 %s1172_s7, %s1151_s8  ;;  %p1370_p2 = scmp.lt.s32.totalorder %s1942_s16, %s1368_s20 }
  0x8e   : > { %s1152_s15 = sshll.u32 %s1011_s10, 6 }
  0x8f   : > { %556 = vrot.lane.b32.xlu1 %v1681_v28, %s1466_s28  ;;  %s1939_s29 = scalar_lea.hbm %s2004_s3, %s1152_s15 }
  0x90   : > { %548 = vrot.lane.b32.xlu0 %v1639_v52, %s1466_s28 }
  0x91   : > { %v451_v18 = vpop.permute.xlu1 %450  ;;  %v443_v26 = vpop.permute.xlu0 %442 }
  0x93   : > { %558 = vrot.lane.b32.xlu1 %v1693_v34, %s1466_s28 }
  0x94   : > { %550 = vrot.lane.b32.xlu0 %v1631_v48, %s1466_s28 }
  0x95   : > { %v430_v57 = vpop.permute.xlu1 %429 }
  0x96   : > { %v422_v41 = vpop.permute.xlu0 %421 }
  0x97   : > { %575 = vrot.lane.b32.xlu1 %v1675_v21, %s1467_s5 }
  0x98   : > { %567 = vrot.lane.b32.xlu0 %v1593_v12, %s1467_s5 }
  0x99   : > { %v432_v61 = vpop.permute.xlu1 %431 }
  0x9a   : > { %v424_v28 = vpop.permute.xlu0 %423 }
  0x9b   : > { %577 = vrot.lane.b32.xlu1 %v1686_v31, %s1467_s5 }
  0x9c   : > { %569 = vrot.lane.b32.xlu0 %v1605_v23, %s1467_s5  ;;  %s1363_s5 = scalar_lea.vmem %s1942_s16, 1024 }
  0x9d   : > { %v383_v52 = vpop.permute.xlu1 %382  ;;  %p1364_p13 = scmp.ne.s32.totalorder %s1942_s16, %s1363_s5  ;;  %p1371_p4 = scmp.lt.s32.totalorder %s1369_s27, %s1363_s5 }
  0x9e   : > { %v381_v34 = vpop.permute.xlu0 %380  ;;  %v583_v24 = vsel %vm579_vm3, %v1573_v1, %v383_v52 }
  0x9f   : > { %v581_v63 = vsel %vm579_vm3, %v1584_v4, %v381_v34  ;;  %v600_v35 = vsel %vm596_vm4, %v583_v24, %v424_v28  ;;  %p1365_p0 = pnand %p1364_p13, %p1541_p3  ;;  %p1372_p5 = por %p1371_p4, %p1370_p2 }
  0xa0   : > { %v598_v7 = vsel %vm596_vm4, %v581_v63, %v422_v41 }
  0xa1   : > { %v391_v47 = vpop.permute.xlu1 %390  ;;  %v615_v10 = vsel %vm613_vm6, %v598_v7, %v443_v26  ;;  %p1366_p1 = pneg %p1365_p0 }
  0xa2   : > { %v389_v48 = vpop.permute.xlu0 %388  ;;  %v591_v15 = vsel %vm579_vm3, %v1570_v0, %v391_v47 }
  0xa3   : > { %v589_v23 = vsel %vm579_vm3, %v1580_v2, %v389_v48  ;;  %v608_v30 = vsel %vm596_vm4, %v591_v15, %v432_v61  ;;  %p1373_p6 = pnand %p1372_p5, %p1366_p1 }
  0xa4   : > { %v606_v5 = vsel %vm596_vm4, %v589_v23, %v430_v57 }
  0xa5   : > { %v453_v50 = vpop.permute.xlu1 %452  ;;  %v623_v8 = vsel %vm613_vm6, %v606_v5, %v451_v18 }
  0xa6   : > { %v445_v27 = vpop.permute.xlu0 %444  ;;  %v625_v32 = vsel %vm613_vm6, %v608_v30, %v453_v50 }
  0xa7   : > { %v617_v1 = vsel %vm613_vm6, %v600_v35, %v445_v27 }
  0xa9   : > { %v482_v51 = vpop.permute.xlu1 %481 }
  0xaa   : > { %v474_v53 = vpop.permute.xlu0 %473  ;;  %v640_v2 = vsel %vm630_vm5, %v623_v8, %v482_v51 }
  0xab   : > { %v632_v13 = vsel %vm630_vm5, %v615_v10, %v474_v53 }
  0xad   : > { %v484_v21 = vpop.permute.xlu1 %483 }
  0xae   : > { %v476_v54 = vpop.permute.xlu0 %475  ;;  %v642_v36 = vsel %vm630_vm5, %v625_v32, %v484_v21 }
  0xaf   : > { %v634_v40 = vsel %vm630_vm5, %v617_v1, %v476_v54 }
  0xb1   : > { %v501_v55 = vpop.permute.xlu1 %500 }
  0xb2   : > { %v493_v12 = vpop.permute.xlu0 %492  ;;  %v657_v4 = vsel %vm647_vm7, %v640_v2, %v501_v55 }
  0xb3   : > { %v649_v16 = vsel %vm647_vm7, %v632_v13, %v493_v12 }
  0xb5   : > { %v503_v56 = vpop.permute.xlu1 %502 }
  0xb6   : > { %v495_v58 = vpop.permute.xlu0 %494  ;;  %v659_v37 = vsel %vm647_vm7, %v642_v36, %v503_v56 }
  0xb7   : > { %v651_v45 = vsel %vm647_vm7, %v634_v40, %v495_v58 }
  0xb9   : > { %v522_v59 = vpop.permute.xlu1 %521 }
  0xba   : > { %v514_v60 = vpop.permute.xlu0 %513  ;;  %v674_v14 = vsel %vm664_vm8, %v657_v4, %v522_v59 }
  0xbb   : > { %v666_v20 = vsel %vm664_vm8, %v649_v16, %v514_v60 }
  0xbd   : > { %v524_v31 = vpop.permute.xlu1 %523 }
  0xbe   : > { %v516_v62 = vpop.permute.xlu0 %515  ;;  %v676_v44 = vsel %vm664_vm8, %v659_v37, %v524_v31 }
  0xbf   : > { %v668_v26 = vsel %vm664_vm8, %v651_v45, %v516_v62 }
  0xc1   : > { %v553_v3 = vpop.permute.xlu1 %552 }
  0xc2   : > { %v545_v6 = vpop.permute.xlu0 %544  ;;  %v691_v17 = vsel %vm681_vm9, %v674_v14, %v553_v3 }
  0xc3   : > { %v683_v25 = vsel %vm681_vm9, %v666_v20, %v545_v6 }
  0xc5   : > { %v555_v9 = vpop.permute.xlu1 %554 }
  0xc6   : > { %v547_v11 = vpop.permute.xlu0 %546  ;;  %v693_v49 = vsel %vm681_vm9, %v676_v44, %v555_v9 }
  0xc7   : > { %v685_v41 = vsel %vm681_vm9, %v668_v26, %v547_v11 }
  0xc9   : > { %v572_v19 = vpop.permute.xlu1 %571 }
  0xca   : > { %v708_v22 = vsel %vm698_vm10, %v691_v17, %v572_v19  ;;  %v564_v29 = vpop.permute.xlu0 %563 }
  0xcb   : > { %1245 = vmatprep.mubr.msk.bf16.mxu1 %vm783_vm11, %v708_v22  ;;  %v700_v0 = vsel %vm698_vm10, %v683_v25, %v564_v29 }
  0xcc   : > { %1237 = vmatprep.mubr.msk.bf16.mxu0 %vm783_vm11, %v700_v0 }
  0xcd   : > { %v393_v33 = vpop.permute.xlu1 %392 }
  0xce   : > { %v385_v38 = vpop.permute.xlu0 %384  ;;  %v593_v7 = vsel %vm579_vm3, %v1617_v39, %v393_v33 }
  0xcf   : > { %v585_v2 = vsel %vm579_vm3, %v1624_v46, %v385_v38 }
  0xd1   : > { %v574_v18 = vpop.permute.xlu1 %573 }
  0xd2   : > { %v710_v57 = vsel %vm698_vm10, %v693_v49, %v574_v18  ;;  %v566_v61 = vpop.permute.xlu0 %565 }
  0xd3   : > { %1246 = vmatmul.mubr.msk.bf16.vlgmr.msra.gmra.mrb[0].mxu1 %vm783_vm11, %v710_v57  ;;  %v702_v28 = vsel %vm698_vm10, %v685_v41, %v566_v61  ;;  %v1122_v61 = vld [vmem:[%s2003_s2] ss:$0 sm:$0xff] }
  0xd4   : > { %1238 = vmatmul.mubr.msk.bf16.vlgmr.msra.gmra.mrb[0].mxu0 %vm783_vm11, %v702_v28 }
  0xd5   : > { %v395_v52 = vpop.permute.xlu1 %394 }
  0xd6   : > { %v387_v34 = vpop.permute.xlu0 %386  ;;  %v595_v14 = vsel %vm579_vm3, %v1703_v42, %v395_v52 }
  0xd7   : > { %v587_v20 = vsel %vm579_vm3, %v1708_v43, %v387_v34 }
  0xd9   : > { %v434_v47 = vpop.permute.xlu1 %433 }
  0xda   : > { %v426_v48 = vpop.permute.xlu0 %425  ;;  %v610_v9 = vsel %vm596_vm4, %v593_v7, %v434_v47 }
  0xdb   : > { %v602_v11 = vsel %vm596_vm4, %v585_v2, %v426_v48 }
  0xdd   : > { %v436_v50 = vpop.permute.xlu1 %435 }
  0xde   : > { %v428_v27 = vpop.permute.xlu0 %427  ;;  %v612_v17 = vsel %vm596_vm4, %v595_v14, %v436_v50 }
  0xdf   : > { %v604_v29 = vsel %vm596_vm4, %v587_v20, %v428_v27 }
  0xe1   : > { %v455_v51 = vpop.permute.xlu1 %454 }
  0xe2   : > { %v447_v53 = vpop.permute.xlu0 %446  ;;  %v627_v10 = vsel %vm613_vm6, %v610_v9, %v455_v51 }
  0xe3   : > { %v619_v15 = vsel %vm613_vm6, %v602_v11, %v447_v53 }
  0xe5   : > { %v457_v21 = vpop.permute.xlu1 %456 }
  0xe6   : > { %v449_v54 = vpop.permute.xlu0 %448  ;;  %v629_v22 = vsel %vm613_vm6, %v612_v17, %v457_v21 }
  0xe7   : > { %v621_v33 = vsel %vm613_vm6, %v604_v29, %v449_v54 }
  0xe9   : > { %v486_v55 = vpop.permute.xlu1 %485 }
  0xea   : > { %v478_v12 = vpop.permute.xlu0 %477  ;;  %v644_v13 = vsel %vm630_vm5, %v627_v10, %v486_v55 }
  0xeb   : > { %v636_v19 = vsel %vm630_vm5, %v619_v15, %v478_v12 }
  0xed   : > { %v488_v56 = vpop.permute.xlu1 %487 }
  0xee   : > { %v480_v58 = vpop.permute.xlu0 %479  ;;  %v646_v30 = vsel %vm630_vm5, %v629_v22, %v488_v56 }
  0xef   : > { %v638_v1 = vsel %vm630_vm5, %v621_v33, %v480_v58 }
  0xf1   : > { %v505_v59 = vpop.permute.xlu1 %504 }
  0xf2   : > { %v497_v60 = vpop.permute.xlu0 %496  ;;  %v661_v39 = vsel %vm647_vm7, %v644_v13, %v505_v59 }
  0xf3   : > { %v653_v24 = vsel %vm647_vm7, %v636_v19, %v497_v60 }
  0xf5   : > { %v507_v31 = vpop.permute.xlu1 %506 }
  0xf6   : > { %v499_v23 = vpop.permute.xlu0 %498  ;;  %v663_v35 = vsel %vm647_vm7, %v646_v30, %v507_v31 }
  0xf7   : > { %v655_v40 = vsel %vm647_vm7, %v638_v1, %v499_v23 }
  0xf9   : > { %v526_v62 = vpop.permute.xlu1 %525 }
  0xfa   : > { %v518_v63 = vpop.permute.xlu0 %517  ;;  %v678_v46 = vsel %vm664_vm8, %v661_v39, %v526_v62 }
  0xfb   : > { %v670_v0 = vsel %vm664_vm8, %v653_v24, %v518_v63 }
  0xfd   : > { %v528_v3 = vpop.permute.xlu1 %527 }
  0xfe   : > { %v520_v5 = vpop.permute.xlu0 %519  ;;  %v680_v37 = vsel %vm664_vm8, %v663_v35, %v528_v3 }
  0xff   : > { %v672_v49 = vsel %vm664_vm8, %v655_v40, %v520_v5 }
 0x101   : > { %v557_v6 = vpop.permute.xlu1 %556 }
 0x102   : > { %v549_v8 = vpop.permute.xlu0 %548  ;;  %v695_v42 = vsel %vm681_vm9, %v678_v46, %v557_v6 }
 0x103   : > { %v687_v43 = vsel %vm681_vm9, %v670_v0, %v549_v8 }
 0x105   : > { %v559_v4 = vpop.permute.xlu1 %558 }
 0x106   : > { %v551_v16 = vpop.permute.xlu0 %550  ;;  %v697_v44 = vsel %vm681_vm9, %v680_v37, %v559_v4 }
 0x107   : > { %v689_v26 = vsel %vm681_vm9, %v672_v49, %v551_v16 }
 0x109   : > { %v576_v25 = vpop.permute.xlu1 %575 }
 0x10a   : > { %v712_v32 = vsel %vm698_vm10, %v695_v42, %v576_v25  ;;  %v568_v36 = vpop.permute.xlu0 %567 }
 0x10b   : > { %1249 = vmatprep.mubr.msk.bf16.mxu1 %vm783_vm11, %v712_v32  ;;  %v704_v38 = vsel %vm698_vm10, %v687_v43, %v568_v36 }
 0x10c   : > { %1241 = vmatprep.mubr.msk.bf16.mxu0 %vm783_vm11, %v704_v38 }
 0x10d   : > { %v578_v45 = vpop.permute.xlu1 %577 }
 0x10e   : > { %v714_v18 = vsel %vm698_vm10, %v697_v44, %v578_v45  ;;  %v570_v57 = vpop.permute.xlu0 %569 }
 0x10f   : > { %1250 = vmatmul.mubr.msk.bf16.gmra.mrb[4].mxu1 %vm783_vm11, %v714_v18  ;;  %v706_v41 = vsel %vm698_vm10, %v689_v26, %v570_v57 }
 0x110   : > { %1242 = vmatmul.mubr.msk.bf16.gmra.mrb[4].mxu0 %vm783_vm11, %v706_v41 }
 0x1a6   : > { %v1247_v28 = vpop.f32.mrb[0].mxu1 }
 0x1a7   : > { %v879_v52 = vadd.f32 %v1247_v28, %v1122_v61  ;;  %v870_v34 = vpop.f32.mrb[1].mxu1  ;;  %v1239_v47 = vpop.f32.mrb[0].mxu0 }
 0x1a8   : > { %v871_v48 = vadd.f32 %v1122_v61, %v870_v34  ;;  %v1248_v50 = vpop.f32.mrb[2].mxu1  ;;  %v847_v27 = vadd.f32 %v1239_v47, %v1122_v61  ;;  %v838_v51 = vpop.f32.mrb[1].mxu0 }
 0x1a9   : > { %v882_v53 = vadd.f32 %v1248_v50, %v1122_v61  ;;  %v873_v21 = vpop.f32.mrb[3].mxu1  ;;  %v839_v54 = vadd.f32 %v1122_v61, %v838_v51  ;;  %v1240_v55 = vpop.f32.mrb[2].mxu0  ;;  %v911_v56 = vmax.f32 %v879_v52, 0.0 }
 0x1aa   : > { %v874_v12 = vadd.f32 %v1122_v61, %v873_v21  ;;  %v850_v58 = vadd.f32 %v1240_v55, %v1122_v61  ;;  %v841_v60 = vpop.f32.mrb[3].mxu0  ;;  %v909_v31 = vmax.f32 %v871_v48, 0.0  ;;  %v903_v63 = vmax.f32 %v847_v27, 0.0 }
 0x1ab   : > { %v912_v59 = vmax.f32 %v882_v53, 0.0  ;;  %v842_v23 = vadd.f32 %v1122_v61, %v841_v60  ;;  %v901_v6 = vmax.f32 %v839_v54, 0.0 }
 0x1ac   : > { %v910_v62 = vmax.f32 %v874_v12, 0.0  ;;  %v904_v3 = vmax.f32 %v850_v58, 0.0 }
 0x1ad   : > { %v1201_v5 = vpack.c.bf16 %v912_v59, %v911_v56  ;;  %v902_v7 = vmax.f32 %v842_v23, 0.0 }
 0x1ae   : > { %v1196_v8 = vpack.c.bf16 %v910_v62, %v909_v31  ;;  %v1181_v9 = vpack.c.bf16 %v904_v3, %v903_v63 }
 0x1af   : > { %1217 = vst [vmem:[%s1926_s6 + $0x28] sm:$0xff] %v1201_v5   ;;  %v1176_v2 = vpack.c.bf16 %v902_v7, %v901_v6 }
 0x1b0   : > { %1216 = vst [vmem:[%s1926_s6 + $0x20] sm:$0xff] %v1196_v8   ;;  %1213 = vst [vmem:[%s1926_s6 + $0x8] sm:$0xff] %v1181_v9  }
 0x1b1   : > { %1177 = vst [vmem:[%s1926_s6] sm:$0xff] %v1176_v2  }
 0x1e2   : > { %v1251_v10 = vpop.f32.mrb[4].mxu1 }
 0x1e3   : > { %v895_v4 = vadd.f32 %v1251_v10, %v1122_v61  ;;  %v886_v11 = vpop.f32.mrb[5].mxu1  ;;  %v1243_v13 = vpop.f32.mrb[4].mxu0 }
 0x1e4   : > { %v887_v14 = vadd.f32 %v1122_v61, %v886_v11  ;;  %v1252_v15 = vpop.f32.mrb[6].mxu1  ;;  %v863_v39 = vadd.f32 %v1243_v13, %v1122_v61  ;;  %v854_v16 = vpop.f32.mrb[5].mxu0 }
 0x1e5   : > { %v898_v17 = vadd.f32 %v1252_v15, %v1122_v61  ;;  %v889_v19 = vpop.f32.mrb[7].mxu1  ;;  %v855_v46 = vadd.f32 %v1122_v61, %v854_v16  ;;  %v1244_v20 = vpop.f32.mrb[6].mxu0  ;;  %v915_v24 = vmax.f32 %v895_v4, 0.0 }
 0x1e6   : > { %v890_v22 = vadd.f32 %v1122_v61, %v889_v19  ;;  %v866_v42 = vadd.f32 %v1244_v20, %v1122_v61  ;;  %v857_v29 = vpop.f32.mrb[7].mxu0  ;;  %v913_v30 = vmax.f32 %v887_v14, 0.0  ;;  %v907_v33 = vmax.f32 %v863_v39, 0.0 }
 0x1e7   : > { %v916_v25 = vmax.f32 %v898_v17, 0.0  ;;  %v858_v0 = vadd.f32 %v1122_v61, %v857_v29  ;;  %v905_v36 = vmax.f32 %v855_v46, 0.0 }
 0x1e8   : > { %v914_v32 = vmax.f32 %v890_v22, 0.0  ;;  %v908_v35 = vmax.f32 %v866_v42, 0.0 }
 0x1e9   : > { %v1211_v43 = vpack.c.bf16 %v916_v25, %v915_v24  ;;  %v906_v1 = vmax.f32 %v858_v0, 0.0 }
 0x1ea   : > { %v1206_v37 = vpack.c.bf16 %v914_v32, %v913_v30  ;;  %v1191_v38 = vpack.c.bf16 %v908_v35, %v907_v33 }
 0x1eb   : > { %1219 = vst [vmem:[%s1926_s6 + $0x38] sm:$0xff] %v1211_v43   ;;  %v1186_v40 = vpack.c.bf16 %v906_v1, %v905_v36 }
 0x1ec   : > { %1218 = vst [vmem:[%s1926_s6 + $0x30] sm:$0xff] %v1206_v37   ;;  %1215 = vst [vmem:[%s1926_s6 + $0x18] sm:$0xff] %v1191_v38  }
 0x1ed   : > { %1214 = vst [vmem:[%s1926_s6 + $0x10] sm:$0xff] %v1186_v40  }
 0x1ee   : > { %1376 = shalt.err (!%p1373_p6)
}
 0x1ef   : > { %s1377_s24 = scalar_lea.hbm %s1939_s29, 1024  ;;  %s1381_s8 = scalar_lea.hbm %s2004_s3, 4096 }
 0x1f0   : > { %p1378_p7 = scmp.ne.s32.totalorder %s1939_s29, %s1377_s24  ;;  %p1382_p11 = scmp.lt.u32.totalorder %s1939_s29, %s2004_s3 }
 0x1f1   : > { %p1383_p12 = scmp.lt.u32.totalorder %s1381_s8, %s1377_s24  ;;  %p1385_p0 = scmp.lt.u32.totalorder %s1377_s24, %s1939_s29 }
 0x1f2   : > { %p1379_p9 = pnand %p1378_p7, %p1541_p3 }
 0x1f3   : > { %p1384_p13 = por %p1383_p12, %p1382_p11 }
 0x1f4   : > { %p1380_p10 = pneg %p1379_p9 }
 0x1f5   : > { %p1386_p1 = por %p1385_p0, %p1384_p13 }
 0x1f7   : > { %p1387_p2 = pnand %p1386_p1, %p1380_p10 }
 0x1f9   : > { %1390 = shalt.err (!%p1387_p2)
}
 0x1fa   : > { %s1469_s9 = smov 64  }
 0x1fb   : > { %1262 = dma.vmem_to_hbm [thread:$0]  (%p1541_p3), %s1942_s16, 1024, %s1939_s29, %s1948_s4, %s1469_s9, %s1469_s9, %s1461_s21  }
 0x1fc PF: > { %p1268_p4 = scmp.ge.s32.totalorder %s1457_s19, 2  ;;  %s1029_s28 = sand.u32 1, %s1429_s12  }
 0x1fd   : > { %s1030_s5 = scalar_lea.sflag [#allocation3], %s1029_s28 }
 0x1fe   : > { %p1265_p5 = pnand %p1268_p4, %p1550_p8 }
 0x200   : > { %1424 = dma.done.wait (!%p1265_p5), %s1030_s5, 1024  }
 0x201   : > { %1426 = vsyncadd (!%p1265_p5), %s1030_s5, 4294966272  ;;  %s16_s19 = sadd.s32 1, %s1457_s19   ;;  %s2007_s12 = smov %s1433_s13 }
 0x202   : > { %p13_p6 = scmp.ge.s32.totalorder %s16_s19, 6   ;;  %s2008_s13 = smov %s1437_s14 }
 0x203   : > { %s2009_s14 = smov %s1559_s30  ;;  %s2010_s15 = smov %s1449_s17 }
 0x204   : > { %s2011_s16 = smov %s1453_s18  ;;  %s2012_s17 = smov %s2015_s22 }
 0x205   : > { %s2013_s18 = smov %s2019_s23  ;;  %15 = sbr.rel (!%p13_p6) target bundleno = 5 (0x5), region = 68 }
 0x20c   :  { %1035 = vsyncpa [#allocation3], 1 }
 0x20d   :  { %1037 = vsyncpa [#allocation3 + $0x1], 1 }

</bundles_post_ra>
